<compile_context>
chip_gen: v7x
topology: tpu7x:2x2x1
jax: 0.10.0
libtpu: 0.0.40
codegen_flags: <defaults>
</compile_context>

<pallas_src>
import jax
import jax.numpy as jnp
from jax.experimental import pallas as pl
from jax.experimental.pallas import tpu as pltpu

_SUB = 8                     # sublanes per (8,128) f32 vreg tile
_LANES = 128
_PACK = _SUB * _LANES        # 1024: batch padding granularity (one full vreg of batch)


def _linear2_kernel(w_ref, b_ref, xt_ref, yt_ref, o_ref, *, chunk_lanes=512):
    """out rows 0:8 = W.x + b ; rows 8:16 = W.y + b  -- pure VPU FMAs on full vregs.

    w_ref : SMEM (In,)        b_ref : SMEM (1,)
    xt_ref, yt_ref : VMEM (In*8, C)   feature i lives in rows [8i, 8i+8)
    o_ref : VMEM (2*8, C)             lane-dense fused output
    """
    n_in = xt_ref.shape[0] // _SUB
    cols = xt_ref.shape[1]
    bias = b_ref[0]

    def do_chunk(c0, cw):
        # Accumulators initialized with the bias folded into the first FMA; each
        # w_ref[i] scalar is read once and shared between the x and y FMAs.
        w0 = w_ref[0]
        acc_x = xt_ref[0:_SUB, c0:c0 + cw] * w0 + bias
        acc_y = yt_ref[0:_SUB, c0:c0 + cw] * w0 + bias
        for i in range(1, n_in):                     # unrolled at trace time (n_in == 4)
            wi = w_ref[i]
            acc_x = acc_x + xt_ref[_SUB * i:_SUB * (i + 1), c0:c0 + cw] * wi
            acc_y = acc_y + yt_ref[_SUB * i:_SUB * (i + 1), c0:c0 + cw] * wi
        o_ref[0:_SUB, c0:c0 + cw] = acc_x.astype(o_ref.dtype)
        o_ref[_SUB:2 * _SUB, c0:c0 + cw] = acc_y.astype(o_ref.dtype)

    # Column-chunked loop (static offsets): keeps live vreg count small and lets
    # loads be scheduled under the FMAs instead of materializing the whole tile.
    cw = min(chunk_lanes, cols)
    for c0 in range(0, cols - cw + 1, cw):
        do_chunk(c0, cw)
    rem = cols % cw
    if rem:
        do_chunk(cols - rem, rem)


def multi_network_forward(x, y, weight, bias, *, lane_tile=65536):
    """Equivalent of MultiNetwork.forward(x, y) = (layer(x), layer(y)).

    x, y   : (B, 4) float32
    weight : (1, 4) float32 (PyTorch Linear layout)
    bias   : (1,)   float32
    returns: tuple of (B, 1) float32 arrays
    """
    B, n_in = x.shape
    n_out, n_in_w = weight.shape
    assert n_in_w == n_in and n_out == 1 and bias.shape == (n_out,)
    out_dtype = x.dtype

    # Pad batch only to a multiple of 1024 (full (8,128) vreg of batch elements).
    b_pad = max(_PACK, pl.cdiv(B, _PACK) * _PACK)
    cols = b_pad // _SUB                     # columns of the repacked layout (mult of 128)
    tb8 = min(lane_tile // _SUB, cols)       # columns per grid block (mult of 128)
    grid = (pl.cdiv(cols, tb8),)             # ragged last block allowed

    def repack(a):
        # (B, In) -> (In, b_pad) -> (In*8, b_pad/8): batch on sublanes AND lanes.
        at = a.astype(jnp.float32).T
        if b_pad != B:
            at = jnp.pad(at, ((0, 0), (0, b_pad - B)))
        return at.reshape(n_in * _SUB, cols)  # free, contiguous reshape

    # TODO(synk): the transpose+pad is one extra HBM pass over x/y for a
    # bandwidth-bound kernel; removing it needs feature-major inputs upstream or
    # CompilerParams(allow_input_fusion=...) to fuse the producer into the call.
    xt = repack(x)
    yt = repack(y)
    w_flat = weight.astype(jnp.float32).reshape(n_in)   # (In,) -> SMEM scalars
    b_flat = bias.astype(jnp.float32).reshape(n_out)    # (1,)  -> SMEM scalar

    smem = pl.BlockSpec(memory_space=pltpu.MemorySpace.SMEM)
    out2 = pl.pallas_call(
        _linear2_kernel,
        out_shape=jax.ShapeDtypeStruct((2 * _SUB, cols), jnp.float32),
        grid=grid,
        in_specs=[
            smem,
            smem,
            pl.BlockSpec((n_in * _SUB, tb8), lambda i: (0, i)),
            pl.BlockSpec((n_in * _SUB, tb8), lambda i: (0, i)),
        ],
        out_specs=pl.BlockSpec((2 * _SUB, tb8), lambda i: (0, i)),
        # TODO(synk): on v7x use pltpu.CORE_PARALLEL (or pl.core_map over a 2-core
        # mesh) on this axis so both TensorCores split the batch tiles.
        compiler_params=pltpu.CompilerParams(
            dimension_semantics=("parallel",),
            vmem_limit_bytes=32 * 1024 * 1024,
        ),
    )(w_flat, b_flat, xt, yt)                 # (16, cols)

    out = out2.reshape(2, b_pad)              # inverse contiguous reshape
    out_x = out[0, :B].reshape(B, n_out).astype(out_dtype)
    out_y = out[1, :B].reshape(B, n_out).astype(out_dtype)
    return out_x, out_y


if __name__ == "__main__":
    key = jax.random.PRNGKey(0)
    kx, ky, kw, kb = jax.random.split(key, 4)

    B, In, Out = 8, 4, 1
    x = jax.random.normal(kx, (B, In), dtype=jnp.float32)
    y = jax.random.normal(ky, (B, In), dtype=jnp.float32)

    # Deterministic parameter init (same shapes as nn.Linear(4, 1)).
    bound = 1.0 / jnp.sqrt(jnp.float32(In))
    weight = jax.random.uniform(kw, (Out, In), minval=-bound, maxval=bound,
                                dtype=jnp.float32)
    bias = jax.random.uniform(kb, (Out,), minval=-bound, maxval=bound,
                              dtype=jnp.float32)

    # Small-shape check (single grid step).
    out_x, out_y = multi_network_forward(x, y, weight, bias)
    jax.block_until_ready((out_x, out_y))
    ref_x = x @ weight.T + bias
    ref_y = y @ weight.T + bias
    assert out_x.shape == (B, Out) and out_y.shape == (B, Out)
    assert jnp.allclose(out_x, ref_x, atol=1e-5, rtol=1e-5)
    assert jnp.allclose(out_y, ref_y, atol=1e-5, rtol=1e-5)

    # Small check that exercises the multi-step grid and ragged last block.
    B2 = 2500
    k2x, k2y = jax.random.split(jax.random.PRNGKey(1), 2)
    x2 = jax.random.normal(k2x, (B2, In), dtype=jnp.float32)
    y2 = jax.random.normal(k2y, (B2, In), dtype=jnp.float32)
    out_x2, out_y2 = multi_network_forward(x2, y2, weight, bias, lane_tile=2048)
    jax.block_until_ready((out_x2, out_y2))
    assert jnp.allclose(out_x2, x2 @ weight.T + bias, atol=1e-5, rtol=1e-5)
    assert jnp.allclose(out_y2, y2 @ weight.T + bias, atol=1e-5, rtol=1e-5)

    print("KERNEL_OK")
</pallas_src>

<mosaic_0001>
module attributes {stable_mosaic.version = 11 : i64} {
  func.func @_linear2_kernel(%arg0: i32, %arg1: memref<4xf32, #tpu.memory_space<smem>>, %arg2: memref<1xf32, #tpu.memory_space<smem>>, %arg3: memref<32x128xf32, #tpu.memory_space<vmem>>, %arg4: memref<32x128xf32, #tpu.memory_space<vmem>>, %arg5: memref<16x128xf32, #tpu.memory_space<vmem>>) attributes {dimension_semantics = [#tpu.dimension_semantics<parallel>], iteration_bounds = array<i64: 1>, scalar_prefetch = 0 : i64, scratch_operands = 0 : i64, tpu.core_type = #tpu.core_type<tc>, window_params = [{transform_indices = @transform_0, window_bounds = array<i64: 4>}, {transform_indices = @transform_1, window_bounds = array<i64: 1>}, {transform_indices = @transform_2, window_bounds = array<i64: 32, 128>}, {transform_indices = @transform_3, window_bounds = array<i64: 32, 128>}, {transform_indices = @transform_4, window_bounds = array<i64: 16, 128>}]} {
    %c0 = arith.constant 0 : index
    %0 = memref.load %arg2[%c0] : memref<1xf32, #tpu.memory_space<smem>>
    %c0_0 = arith.constant 0 : index
    %1 = memref.load %arg1[%c0_0] : memref<4xf32, #tpu.memory_space<smem>>
    %c0_1 = arith.constant 0 : index
    %c0_2 = arith.constant 0 : index
    %2 = vector.load %arg3[%c0_1, %c0_2] : memref<32x128xf32, #tpu.memory_space<vmem>>, vector<8x128xf32>
    %3 = vector.broadcast %1 : f32 to vector<8x128xf32>
    %4 = arith.mulf %2, %3 : vector<8x128xf32>
    %5 = vector.broadcast %0 : f32 to vector<8x128xf32>
    %6 = arith.addf %4, %5 : vector<8x128xf32>
    %c0_3 = arith.constant 0 : index
    %c0_4 = arith.constant 0 : index
    %7 = vector.load %arg4[%c0_3, %c0_4] : memref<32x128xf32, #tpu.memory_space<vmem>>, vector<8x128xf32>
    %8 = vector.broadcast %1 : f32 to vector<8x128xf32>
    %9 = arith.mulf %7, %8 : vector<8x128xf32>
    %10 = vector.broadcast %0 : f32 to vector<8x128xf32>
    %11 = arith.addf %9, %10 : vector<8x128xf32>
    %c1 = arith.constant 1 : index
    %12 = memref.load %arg1[%c1] : memref<4xf32, #tpu.memory_space<smem>>
    %c8 = arith.constant 8 : index
    %c0_5 = arith.constant 0 : index
    %13 = vector.load %arg3[%c8, %c0_5] : memref<32x128xf32, #tpu.memory_space<vmem>>, vector<8x128xf32>
    %14 = vector.broadcast %12 : f32 to vector<8x128xf32>
    %15 = arith.mulf %13, %14 : vector<8x128xf32>
    %16 = arith.addf %6, %15 : vector<8x128xf32>
    %c8_6 = arith.constant 8 : index
    %c0_7 = arith.constant 0 : index
    %17 = vector.load %arg4[%c8_6, %c0_7] : memref<32x128xf32, #tpu.memory_space<vmem>>, vector<8x128xf32>
    %18 = vector.broadcast %12 : f32 to vector<8x128xf32>
    %19 = arith.mulf %17, %18 : vector<8x128xf32>
    %20 = arith.addf %11, %19 : vector<8x128xf32>
    %c2 = arith.constant 2 : index
    %21 = memref.load %arg1[%c2] : memref<4xf32, #tpu.memory_space<smem>>
    %c16 = arith.constant 16 : index
    %c0_8 = arith.constant 0 : index
    %22 = vector.load %arg3[%c16, %c0_8] : memref<32x128xf32, #tpu.memory_space<vmem>>, vector<8x128xf32>
    %23 = vector.broadcast %21 : f32 to vector<8x128xf32>
    %24 = arith.mulf %22, %23 : vector<8x128xf32>
    %25 = arith.addf %16, %24 : vector<8x128xf32>
    %c16_9 = arith.constant 16 : index
    %c0_10 = arith.constant 0 : index
    %26 = vector.load %arg4[%c16_9, %c0_10] : memref<32x128xf32, #tpu.memory_space<vmem>>, vector<8x128xf32>
    %27 = vector.broadcast %21 : f32 to vector<8x128xf32>
    %28 = arith.mulf %26, %27 : vector<8x128xf32>
    %29 = arith.addf %20, %28 : vector<8x128xf32>
    %c3 = arith.constant 3 : index
    %30 = memref.load %arg1[%c3] : memref<4xf32, #tpu.memory_space<smem>>
    %c24 = arith.constant 24 : index
    %c0_11 = arith.constant 0 : index
    %31 = vector.load %arg3[%c24, %c0_11] : memref<32x128xf32, #tpu.memory_space<vmem>>, vector<8x128xf32>
    %32 = vector.broadcast %30 : f32 to vector<8x128xf32>
    %33 = arith.mulf %31, %32 : vector<8x128xf32>
    %34 = arith.addf %25, %33 : vector<8x128xf32>
    %c24_12 = arith.constant 24 : index
    %c0_13 = arith.constant 0 : index
    %35 = vector.load %arg4[%c24_12, %c0_13] : memref<32x128xf32, #tpu.memory_space<vmem>>, vector<8x128xf32>
    %36 = vector.broadcast %30 : f32 to vector<8x128xf32>
    %37 = arith.mulf %35, %36 : vector<8x128xf32>
    %38 = arith.addf %29, %37 : vector<8x128xf32>
    %c0_14 = arith.constant 0 : index
    %c0_15 = arith.constant 0 : index
    %39 = vector.load %arg5[%c0_14, %c0_15] : memref<16x128xf32, #tpu.memory_space<vmem>>, vector<8x128xf32>
    tpu.vector_store %arg5[%c0_14, %c0_15], %34 {strides = array<i32>} : memref<16x128xf32, #tpu.memory_space<vmem>>, vector<8x128xf32>,
    %c8_16 = arith.constant 8 : index
    %c0_17 = arith.constant 0 : index
    %40 = vector.load %arg5[%c8_16, %c0_17] : memref<16x128xf32, #tpu.memory_space<vmem>>, vector<8x128xf32>
    tpu.vector_store %arg5[%c8_16, %c0_17], %38 {strides = array<i32>} : memref<16x128xf32, #tpu.memory_space<vmem>>, vector<8x128xf32>,
    return
  }
  func.func @transform_0(%arg0: i32) -> i32 {
    %c0_i32 = arith.constant 0 : i32
    %c0_i32_0 = arith.constant 0 : i32
    return %c0_i32 : i32
  }
  func.func @transform_1(%arg0: i32) -> i32 {
    %c0_i32 = arith.constant 0 : i32
    %c0_i32_0 = arith.constant 0 : i32
    return %c0_i32 : i32
  }
  func.func @transform_2(%arg0: i32) -> (i32, i32) {
    %c0_i32 = arith.constant 0 : i32
    %c0_i32_0 = arith.constant 0 : i32
    return %c0_i32, %arg0 : i32, i32
  }
  func.func @transform_3(%arg0: i32) -> (i32, i32) {
    %c0_i32 = arith.constant 0 : i32
    %c0_i32_0 = arith.constant 0 : i32
    return %c0_i32, %arg0 : i32, i32
  }
  func.func @transform_4(%arg0: i32) -> (i32, i32) {
    %c0_i32 = arith.constant 0 : i32
    %c0_i32_0 = arith.constant 0 : i32
    return %c0_i32, %arg0 : i32, i32
  }
}

</mosaic_0001>

<bundles_post_ra>
// kernel: tpu_custom_call.1
= control target key start
LH: loop header
LB: loop body
LE: loop exit
PB: predicated region body
PF: predicated region fallthrough
CT: control target
= control target key end

     0   :  { %10 = vsyncpa [#allocation6], 0  ;;  %s292_s0 = inlined_call_operand.vmem [shape: f32[4], index: 0, kind: input, shape index: {}]   ;;  %s293_s1 = inlined_call_operand.<no memory space> [shape: f32[1], index: 1, kind: input, shape index: {}]   ;;  %s294_s2 = inlined_call_operand.hbm [shape: f32[32,128], index: 2, kind: input, shape index: {}]   ;;  %s295_s3 = inlined_call_operand.hbm [shape: f32[32,128], index: 3, kind: input, shape index: {}]   ;;  %s296_s4 = inlined_call_operand.hbm [shape: f32[16,128], index: 4, kind: output, shape index: {}]  }
   0x1   :  { %11 = vsyncpa [#allocation4], 0 }
   0x2   :  { %12 = vsyncpa [#allocation9], 0 }
   0x3   :  { %13 = vsyncpa [#allocation5], 0  ;;  %s20_s17 = sshll.u32 %s292_s0, 4  ;;  %s21_s17 = int_to_ptr.vmem [resolvable:$true] %s20_s17 }
   0x4   :  { %s124_s18 = scalar_lea.vmem %s21_s17, 16  ;;  %p129_p1 = scmp.lt.s32.totalorder %s21_s17, %s21_s17 }
   0x5   :  { %p125_p0 = scmp.ne.s32.totalorder %s21_s17, %s124_s18  ;;  %p130_p2 = scmp.lt.s32.totalorder %s124_s18, %s124_s18 }
   0x7   :  { %p131_p3 = por %p130_p2, %p129_p1 }
   0x9   :  { %p132_p4 = pnand %p131_p3, %p125_p0 }
   0xb   :  { %135 = shalt.err (!%p132_p4)
}
   0xc   :  { %s210_s19 = smov [#allocation3]   ;;  %s211_s20 = smov [#allocation7]  }
   0xd   :  { %23 = dma.vmem_to_smem %s21_s17, 16, %s210_s19, [#allocation6]  }
   0xe   :  { %s31_s21 = sshll.u32 %s211_s20, 4  ;;  %s136_s24 = scalar_lea.hbm %s294_s2, 512  ;;  %s32_s21 = int_to_ptr.vmem [resolvable:$true] %s31_s21 }
   0xf   :  { %p137_p5 = scmp.ne.s32.totalorder %s294_s2, %s136_s24  ;;  %p140_p6 = scmp.lt.u32.totalorder %s136_s24, %s294_s2 }
  0x11   :  { %p142_p7 = pnand %p140_p6, %p137_p5 }
  0x13   :  { %145 = shalt.err (!%p142_p7)
}
  0x14   :  { %s146_s28 = scalar_lea.vmem %s32_s21, 512  ;;  %p151_p9 = scmp.lt.s32.totalorder %s32_s21, %s32_s21 }
  0x15   :  { %p147_p8 = scmp.ne.s32.totalorder %s32_s21, %s146_s28  ;;  %p152_p10 = scmp.lt.s32.totalorder %s146_s28, %s146_s28 }
  0x17   :  { %p153_p11 = por %p152_p10, %p151_p9 }
  0x19   :  { %p154_p12 = pnand %p153_p11, %p147_p8 }
  0x1b   :  { %157 = shalt.err (!%p154_p12)
}
  0x1c   :  { %s212_s29 = smov 128   ;;  %s213_s30 = smov 8  }
  0x1d   :  { %37 = dma.hbm_to_vmem [thread:$0]  %s294_s2, 512, %s32_s21, [#allocation4], %s212_s29, %s212_s29, %s213_s30  }
  0x1e   :  { %s214_s7 = smov [#allocation8]   ;;  %s158_s11 = scalar_lea.hbm %s295_s3, 512 }
  0x1f   :  { %s43_s8 = sshll.u32 %s214_s7, 4  ;;  %p159_p13 = scmp.ne.s32.totalorder %s295_s3, %s158_s11  ;;  %s44_s8 = int_to_ptr.vmem [resolvable:$true] %s43_s8 }
  0x20   :  { %p162_p0 = scmp.lt.u32.totalorder %s158_s11, %s295_s3 }
  0x22   :  { %p164_p1 = pnand %p162_p0, %p159_p13 }
  0x24   :  { %167 = shalt.err (!%p164_p1)
}
  0x25   :  { %s168_s16 = scalar_lea.vmem %s44_s8, 512  ;;  %p173_p3 = scmp.lt.s32.totalorder %s44_s8, %s44_s8 }
  0x26   :  { %p169_p2 = scmp.ne.s32.totalorder %s44_s8, %s168_s16  ;;  %p174_p4 = scmp.lt.s32.totalorder %s168_s16, %s168_s16 }
  0x28   :  { %p175_p5 = por %p174_p4, %p173_p3 }
  0x2a   :  { %p176_p6 = pnand %p175_p5, %p169_p2 }
  0x2c   :  { %179 = shalt.err (!%p176_p6)
}
  0x2d   :  { %49 = dma.hbm_to_vmem [thread:$0]  %s295_s3, 512, %s44_s8, [#allocation9], %s212_s29, %s212_s29, %s213_s30  }
  0x2e   :  { %202 = dma.done.wait [#allocation6], 16  }
  0x2f   :  { %203 = vsyncadd [#allocation6], 4294967280 }
  0x30   :  { %204 = dma.done.wait [#allocation4], 512  }
  0x31   :  { %205 = vsyncadd [#allocation4], 4294966784 }
  0x32   :  { %206 = dma.done.wait [#allocation9], 512  }
  0x33   :  { %207 = vsyncadd [#allocation9], 4294966784 }
  0x34   :  { %59 = sfence }
  0x35   :  { %s61_s18 = sld [smem:[#allocation3]]  ;;  %s115_s19 = sld [smem:[#allocation3 + $0x1]]  ;;  %v62_v0 = vld [vmem:[#allocation7] sm:$0xff]  ;;  %v71_v1 = vld [vmem:[#allocation7 + $0x8] sm:$0xff]  ;;  %v65_v5 = vstv %s293_s1  ;;  %v79_v7 = vld [vmem:[#allocation7 + $0x10] sm:$0xff] }
  0x36   :  { %s116_s20 = sld [smem:[#allocation3 + $0x2]]  ;;  %s117_s21 = sld [smem:[#allocation3 + $0x3]]  ;;  %v67_v2 = vld [vmem:[#allocation8] sm:$0xff]  ;;  %v75_v3 = vld [vmem:[#allocation8 + $0x8] sm:$0xff]  ;;  %v83_v11 = vld [vmem:[#allocation8 + $0x10] sm:$0xff] }
  0x37   :  { %v87_v12 = vld [vmem:[#allocation7 + $0x18] sm:$0xff]  ;;  %s215_s1 = smov [#allocation10]  }
  0x38   :  { %v91_v18 = vld [vmem:[#allocation8 + $0x18] sm:$0xff]  ;;  %s101_s3 = sshll.u32 %s215_s1, 4  ;;  %s102_s3 = int_to_ptr.vmem [resolvable:$true] %s101_s3 }
  0x39   :  { %s180_s24 = scalar_lea.vmem %s102_s3, 256  ;;  %p185_p8 = scmp.lt.s32.totalorder %s102_s3, %s102_s3 }
  0x3a   :  { %p181_p7 = scmp.ne.s32.totalorder %s102_s3, %s180_s24  ;;  %p186_p9 = scmp.lt.s32.totalorder %s180_s24, %s180_s24 }
  0x3b   :  { %v63_v4 = vstv %s61_s18  ;;  %v72_v6 = vstv %s115_s19 }
  0x3c   :  { %v64_v8 = vmul.f32 %v63_v4, %v62_v0  ;;  %v73_v9 = vmul.f32 %v72_v6, %v71_v1  ;;  %v80_v10 = vstv %s116_s20  ;;  %v88_v13 = vstv %s117_s21  ;;  %p187_p10 = por %p186_p9, %p185_p8 }
  0x3d   :  { %v68_v14 = vmul.f32 %v67_v2, %v63_v4  ;;  %v76_v15 = vmul.f32 %v75_v3, %v72_v6  ;;  %v81_v17 = vmul.f32 %v80_v10, %v79_v7  ;;  %v84_v20 = vmul.f32 %v83_v11, %v80_v10 }
  0x3e   :  { %v66_v16 = vadd.f32 %v65_v5, %v64_v8  ;;  %v89_v22 = vmul.f32 %v88_v13, %v87_v12  ;;  %v92_v24 = vmul.f32 %v91_v18, %v88_v13  ;;  %p188_p11 = pnand %p187_p10, %p181_p7 }
  0x3f   :  { %v69_v19 = vadd.f32 %v68_v14, %v65_v5 }
  0x40   :  { %v74_v21 = vadd.f32 %v73_v9, %v66_v16 }
  0x41   :  { %v77_v23 = vadd.f32 %v76_v15, %v69_v19 }
  0x42   :  { %v82_v25 = vadd.f32 %v81_v17, %v74_v21 }
  0x43   :  { %v85_v26 = vadd.f32 %v84_v20, %v77_v23 }
  0x44   :  { %v90_v27 = vadd.f32 %v89_v22, %v82_v25 }
  0x45   :  { %v93_v28 = vadd.f32 %v92_v24, %v85_v26 }
  0x46   :  { %94 = vst [vmem:[#allocation10] sm:$0xff] %v90_v27 }
  0x47   :  { %95 = vst [vmem:[#allocation10 + $0x8] sm:$0xff] %v93_v28 }
  0x48   :  { %191 = shalt.err (!%p188_p11)
}
  0x49   :  { %s192_s0 = scalar_lea.hbm %s296_s4, 256 }
  0x4a   :  { %p193_p12 = scmp.ne.s32.totalorder %s296_s4, %s192_s0  ;;  %p196_p13 = scmp.lt.u32.totalorder %s192_s0, %s296_s4 }
  0x4c   :  { %p198_p0 = pnand %p196_p13, %p193_p12 }
  0x4e   :  { %201 = shalt.err (!%p198_p0)
}
  0x4f   :  { %107 = dma.vmem_to_hbm [thread:$0]  %s102_s3, 256, %s296_s4, [#allocation5], %s212_s29, %s212_s29, %s213_s30  }
  0x50   :  { %208 = dma.done.wait [#allocation5], 256  }
  0x51   :  { %209 = vsyncadd [#allocation5], 4294967040 }
  0x52   :  { %111 = vsyncpa [#allocation4], 1 }
  0x53   :  { %112 = vsyncpa [#allocation9], 1 }
  0x54   :  { %113 = vsyncpa [#allocation5], 1 }
  0x55   :  { %114 = vsyncpa [#allocation6], 1 }

</bundles_post_ra>
